<compile_context>
chip_gen: v6e
topology: v6e:2x2x1
jax: 0.10.0
libtpu: 0.0.40
codegen_flags: <defaults>
</compile_context>

<pallas_src>
import functools

import jax
import jax.numpy as jnp
from jax.experimental import pallas as pl
from jax.experimental.pallas import tpu as pltpu

RES = 4
DEPTH = 5
HIDDEN_MULT = 32
TOKEN_MULT = 32

INPUT_SIZE = RES * 3             # 12
HIDDEN_DIM = RES * HIDDEN_MULT   # 128
TOKEN_SIZE = RES * TOKEN_MULT    # 128

# Packing layers 1..4 into one [DEPTH-1, 128, 128] tensor relies on the default
# module config where hidden_dim == token_size (both res*32).
assert HIDDEN_DIM == TOKEN_SIZE


def _round_up(x, m):
    return ((x + m - 1) // m) * m


def _mlp_kernel(x_ref, w1_ref, w_ref, b_ref, o_ref, *, mm_dtype):
    """Fused 5-layer MLP on one batch tile: h = relu(h @ W[l] + b[l])."""
    # Layer 0: [tile_b, 12] @ [12, 128].  K=12 is the full array dim -> no
    # zero-padded columns are ever streamed from HBM or fed to the MXU.
    h = jnp.dot(x_ref[...].astype(mm_dtype), w1_ref[...],
                preferred_element_type=jnp.float32)
    h = jnp.maximum(h + b_ref[0], 0.0)                # bias [1,128] broadcasts
    for l in range(1, DEPTH):                         # static unroll, 4 layers
        h = jnp.dot(h.astype(mm_dtype), w_ref[l - 1],
                    preferred_element_type=jnp.float32)
        h = jnp.maximum(h + b_ref[l], 0.0)
    o_ref[...] = h


def pack_params(weights, biases, matmul_dtype=jnp.bfloat16):
    """W1 [12,128] + stacked W2..W5 [4,128,128] in matmul dtype; biases [5,1,128] f32."""
    w1 = jnp.asarray(weights[0], jnp.float32).astype(matmul_dtype)
    w_rest = jnp.stack([jnp.asarray(w, jnp.float32) for w in weights[1:]],
                       axis=0).astype(matmul_dtype)
    b_stacked = jnp.stack([jnp.asarray(b, jnp.float32).reshape(1, HIDDEN_DIM)
                           for b in biases], axis=0)
    return w1, w_rest, b_stacked


def global_input_offset_mlp(x, w1, w_rest, b_stacked, *, tile_b=512):
    """x: [B, 12] f32.  Returns [B, 128] f32."""
    B = x.shape[0]
    assert x.shape[1] == INPUT_SIZE
    assert w1.shape == (INPUT_SIZE, HIDDEN_DIM)
    assert w_rest.shape == (DEPTH - 1, HIDDEN_DIM, HIDDEN_DIM)
    assert b_stacked.shape == (DEPTH, 1, HIDDEN_DIM)

    # Batch tile: multiple of 8 (f32 sublane); don't exceed the batch (rounded
    # up to 8) so tiny batches don't run an oversized, mostly-empty block.
    tile_b = max(8, min(tile_b, _round_up(B, 8)))
    tile_b = _round_up(tile_b, 8)
    grid = (pl.cdiv(B, tile_b),)   # partial last block: output rows are masked

    flops = (2 * B * (INPUT_SIZE * HIDDEN_DIM
                      + (DEPTH - 1) * HIDDEN_DIM * HIDDEN_DIM)
             + 2 * DEPTH * B * HIDDEN_DIM)            # bias + relu
    bytes_accessed = (x.size * x.dtype.itemsize
                      + B * TOKEN_SIZE * 4
                      + w1.size * w1.dtype.itemsize
                      + w_rest.size * w_rest.dtype.itemsize
                      + b_stacked.size * b_stacked.dtype.itemsize)

    kernel = functools.partial(_mlp_kernel, mm_dtype=w1.dtype)

    return pl.pallas_call(
        kernel,
        out_shape=jax.ShapeDtypeStruct((B, TOKEN_SIZE), jnp.float32),
        grid=grid,
        in_specs=[
            # activations: tiled over batch; last dim 12 == full dim (un-padded)
            pl.BlockSpec((tile_b, INPUT_SIZE), lambda i: (i, 0)),
            # params: whole array, constant block index -> fetched to VMEM once
            # and kept resident across all batch-grid steps (~130 KiB in bf16)
            pl.BlockSpec((INPUT_SIZE, HIDDEN_DIM), lambda i: (0, 0)),
            pl.BlockSpec((DEPTH - 1, HIDDEN_DIM, HIDDEN_DIM),
                         lambda i: (0, 0, 0)),
            pl.BlockSpec((DEPTH, 1, HIDDEN_DIM), lambda i: (0, 0, 0)),
        ],
        out_specs=pl.BlockSpec((tile_b, TOKEN_SIZE), lambda i: (i, 0)),
        compiler_params=pltpu.CompilerParams(
            # "parallel" is safe on every generation; on v7x use
            # pltpu.CORE_PARALLEL on this axis (with >= 2 grid steps) to split
            # the batch across both TensorCores.
            dimension_semantics=("parallel",)),
        cost_estimate=pl.CostEstimate(flops=flops, transcendentals=0,
                                      bytes_accessed=bytes_accessed),
    )(x, w1, w_rest, b_stacked)


def _init_params(key):
    """Deterministic synthetic parameters (PyTorch Linear init, W as [in,out])."""
    layer_dims = [(INPUT_SIZE, HIDDEN_DIM)]
    for _ in range(DEPTH - 2):
        layer_dims.append((HIDDEN_DIM, HIDDEN_DIM))
    layer_dims.append((HIDDEN_DIM, TOKEN_SIZE))

    weights, biases = [], []
    for fan_in, fan_out in layer_dims:
        key, kw, kb = jax.random.split(key, 3)
        scale = 1.0 / jnp.sqrt(fan_in)
        weights.append(jax.random.uniform(kw, (fan_in, fan_out), jnp.float32,
                                          -scale, scale))
        biases.append(jax.random.uniform(kb, (fan_out,), jnp.float32,
                                         -scale, scale))
    return weights, biases


def _reference(x, weights, biases):
    h = x
    for w, b in zip(weights, biases):
        h = jnp.maximum(h @ w + b, 0.0)   # ReLU after every layer (incl. last)
    return h


if __name__ == "__main__":
    key = jax.random.PRNGKey(0)
    key, kx = jax.random.split(key)

    BATCH = 40  # small test batch; deliberately not a multiple of the tile
    x = jax.random.normal(kx, (BATCH, INPUT_SIZE), jnp.float32)

    weights, biases = _init_params(key)
    ref = _reference(x, weights, biases)

    # Exact f32 path (single grid step at this batch size).
    w1_f32, wr_f32, b_st = pack_params(weights, biases, jnp.float32)
    out = jax.block_until_ready(
        global_input_offset_mlp(x, w1_f32, wr_f32, b_st))
    assert out.shape == (BATCH, TOKEN_SIZE)
    assert jnp.allclose(out, ref, atol=1e-5, rtol=1e-5), "mismatch (f32)"

    # Small tile: multi-step grid with a masked partial last block (40 = 16+16+8).
    out_tiled = jax.block_until_ready(
        global_input_offset_mlp(x, w1_f32, wr_f32, b_st, tile_b=16))
    assert jnp.allclose(out_tiled, ref, atol=1e-5, rtol=1e-5), "mismatch (tiled)"

    # Default bf16-matmul path (f32 accumulation); loose tolerance vs f32 ref.
    w1_bf, wr_bf, b_st_bf = pack_params(weights, biases)   # bf16 by default
    out_bf = jax.block_until_ready(
        global_input_offset_mlp(x, w1_bf, wr_bf, b_st_bf))
    assert jnp.allclose(out_bf, ref, atol=5e-2, rtol=5e-2), "mismatch (bf16)"

    print("KERNEL_OK")
</pallas_src>

<mosaic_0001>
module attributes {stable_mosaic.version = 11 : i64} {
  func.func @_mlp_kernel(%arg0: i32, %arg1: memref<40x12xf32, #tpu.memory_space<vmem>>, %arg2: memref<12x128xf32, #tpu.memory_space<vmem>>, %arg3: memref<4x128x128xf32, #tpu.memory_space<vmem>>, %arg4: memref<5x1x128xf32, #tpu.memory_space<vmem>>, %arg5: memref<40x128xf32, #tpu.memory_space<vmem>>) attributes {dimension_semantics = [#tpu.dimension_semantics<parallel>], iteration_bounds = array<i64: 1>, scalar_prefetch = 0 : i64, scratch_operands = 0 : i64, tpu.core_type = #tpu.core_type<tc>, window_params = [{transform_indices = @transform_0, window_bounds = array<i64: 40, 12>}, {pipeline_mode = #tpu.pipeline_mode<synchronous>, transform_indices = @transform_1, window_bounds = array<i64: 12, 128>}, {pipeline_mode = #tpu.pipeline_mode<synchronous>, transform_indices = @transform_2, window_bounds = array<i64: 4, 128, 128>}, {pipeline_mode = #tpu.pipeline_mode<synchronous>, transform_indices = @transform_3, window_bounds = array<i64: 5, 1, 128>}, {transform_indices = @transform_4, window_bounds = array<i64: 40, 128>}]} {
    %c0 = arith.constant 0 : index
    %c0_0 = arith.constant 0 : index
    %0 = vector.load %arg1[%c0, %c0_0] : memref<40x12xf32, #tpu.memory_space<vmem>>, vector<40x12xf32>
    %c0_1 = arith.constant 0 : index
    %c0_2 = arith.constant 0 : index
    %1 = vector.load %arg2[%c0_1, %c0_2] : memref<12x128xf32, #tpu.memory_space<vmem>>, vector<12x128xf32>
    %cst = arith.constant dense<0.000000e+00> : vector<40x128xf32>
    %2 = tpu.matmul %0, %1, %cst {dimension_numbers = #tpu.dot_dimension_numbers<[1], [0], [0], [1], [0, 0, 1, 1], [], []>} : vector<40x12xf32>, vector<12x128xf32>, vector<40x128xf32> -> vector<40x128xf32>
    %c0_3 = arith.constant 0 : index
    %c0_4 = arith.constant 0 : index
    %c0_5 = arith.constant 0 : index
    %3 = vector.load %arg4[%c0_3, %c0_4, %c0_5] : memref<5x1x128xf32, #tpu.memory_space<vmem>>, vector<1x1x128xf32>
    %4 = vector.shape_cast %3 : vector<1x1x128xf32> to vector<1x128xf32>
    %5 = vector.broadcast %4 : vector<1x128xf32> to vector<40x128xf32>
    %6 = arith.addf %2, %5 : vector<40x128xf32>
    %cst_6 = arith.constant 0.000000e+00 : f32
    %7 = vector.broadcast %cst_6 : f32 to vector<40x128xf32>
    %8 = arith.maximumf %6, %7 : vector<40x128xf32>
    %c0_7 = arith.constant 0 : index
    %c0_8 = arith.constant 0 : index
    %c0_9 = arith.constant 0 : index
    %9 = vector.load %arg3[%c0_7, %c0_8, %c0_9] : memref<4x128x128xf32, #tpu.memory_space<vmem>>, vector<1x128x128xf32>
    %10 = vector.shape_cast %9 : vector<1x128x128xf32> to vector<128x128xf32>
    %cst_10 = arith.constant dense<0.000000e+00> : vector<40x128xf32>
    %11 = tpu.matmul %8, %10, %cst_10 {dimension_numbers = #tpu.dot_dimension_numbers<[1], [0], [0], [1], [0, 0, 1, 1], [], []>} : vector<40x128xf32>, vector<128x128xf32>, vector<40x128xf32> -> vector<40x128xf32>
    %c1 = arith.constant 1 : index
    %c0_11 = arith.constant 0 : index
    %c0_12 = arith.constant 0 : index
    %12 = vector.load %arg4[%c1, %c0_11, %c0_12] : memref<5x1x128xf32, #tpu.memory_space<vmem>>, vector<1x1x128xf32>
    %13 = vector.shape_cast %12 : vector<1x1x128xf32> to vector<1x128xf32>
    %14 = vector.broadcast %13 : vector<1x128xf32> to vector<40x128xf32>
    %15 = arith.addf %11, %14 : vector<40x128xf32>
    %cst_13 = arith.constant 0.000000e+00 : f32
    %16 = vector.broadcast %cst_13 : f32 to vector<40x128xf32>
    %17 = arith.maximumf %15, %16 : vector<40x128xf32>
    %c1_14 = arith.constant 1 : index
    %c0_15 = arith.constant 0 : index
    %c0_16 = arith.constant 0 : index
    %18 = vector.load %arg3[%c1_14, %c0_15, %c0_16] : memref<4x128x128xf32, #tpu.memory_space<vmem>>, vector<1x128x128xf32>
    %19 = vector.shape_cast %18 : vector<1x128x128xf32> to vector<128x128xf32>
    %cst_17 = arith.constant dense<0.000000e+00> : vector<40x128xf32>
    %20 = tpu.matmul %17, %19, %cst_17 {dimension_numbers = #tpu.dot_dimension_numbers<[1], [0], [0], [1], [0, 0, 1, 1], [], []>} : vector<40x128xf32>, vector<128x128xf32>, vector<40x128xf32> -> vector<40x128xf32>
    %c2 = arith.constant 2 : index
    %c0_18 = arith.constant 0 : index
    %c0_19 = arith.constant 0 : index
    %21 = vector.load %arg4[%c2, %c0_18, %c0_19] : memref<5x1x128xf32, #tpu.memory_space<vmem>>, vector<1x1x128xf32>
    %22 = vector.shape_cast %21 : vector<1x1x128xf32> to vector<1x128xf32>
    %23 = vector.broadcast %22 : vector<1x128xf32> to vector<40x128xf32>
    %24 = arith.addf %20, %23 : vector<40x128xf32>
    %cst_20 = arith.constant 0.000000e+00 : f32
    %25 = vector.broadcast %cst_20 : f32 to vector<40x128xf32>
    %26 = arith.maximumf %24, %25 : vector<40x128xf32>
    %c2_21 = arith.constant 2 : index
    %c0_22 = arith.constant 0 : index
    %c0_23 = arith.constant 0 : index
    %27 = vector.load %arg3[%c2_21, %c0_22, %c0_23] : memref<4x128x128xf32, #tpu.memory_space<vmem>>, vector<1x128x128xf32>
    %28 = vector.shape_cast %27 : vector<1x128x128xf32> to vector<128x128xf32>
    %cst_24 = arith.constant dense<0.000000e+00> : vector<40x128xf32>
    %29 = tpu.matmul %26, %28, %cst_24 {dimension_numbers = #tpu.dot_dimension_numbers<[1], [0], [0], [1], [0, 0, 1, 1], [], []>} : vector<40x128xf32>, vector<128x128xf32>, vector<40x128xf32> -> vector<40x128xf32>
    %c3 = arith.constant 3 : index
    %c0_25 = arith.constant 0 : index
    %c0_26 = arith.constant 0 : index
    %30 = vector.load %arg4[%c3, %c0_25, %c0_26] : memref<5x1x128xf32, #tpu.memory_space<vmem>>, vector<1x1x128xf32>
    %31 = vector.shape_cast %30 : vector<1x1x128xf32> to vector<1x128xf32>
    %32 = vector.broadcast %31 : vector<1x128xf32> to vector<40x128xf32>
    %33 = arith.addf %29, %32 : vector<40x128xf32>
    %cst_27 = arith.constant 0.000000e+00 : f32
    %34 = vector.broadcast %cst_27 : f32 to vector<40x128xf32>
    %35 = arith.maximumf %33, %34 : vector<40x128xf32>
    %c3_28 = arith.constant 3 : index
    %c0_29 = arith.constant 0 : index
    %c0_30 = arith.constant 0 : index
    %36 = vector.load %arg3[%c3_28, %c0_29, %c0_30] : memref<4x128x128xf32, #tpu.memory_space<vmem>>, vector<1x128x128xf32>
    %37 = vector.shape_cast %36 : vector<1x128x128xf32> to vector<128x128xf32>
    %cst_31 = arith.constant dense<0.000000e+00> : vector<40x128xf32>
    %38 = tpu.matmul %35, %37, %cst_31 {dimension_numbers = #tpu.dot_dimension_numbers<[1], [0], [0], [1], [0, 0, 1, 1], [], []>} : vector<40x128xf32>, vector<128x128xf32>, vector<40x128xf32> -> vector<40x128xf32>
    %c4 = arith.constant 4 : index
    %c0_32 = arith.constant 0 : index
    %c0_33 = arith.constant 0 : index
    %39 = vector.load %arg4[%c4, %c0_32, %c0_33] : memref<5x1x128xf32, #tpu.memory_space<vmem>>, vector<1x1x128xf32>
    %40 = vector.shape_cast %39 : vector<1x1x128xf32> to vector<1x128xf32>
    %41 = vector.broadcast %40 : vector<1x128xf32> to vector<40x128xf32>
    %42 = arith.addf %38, %41 : vector<40x128xf32>
    %cst_34 = arith.constant 0.000000e+00 : f32
    %43 = vector.broadcast %cst_34 : f32 to vector<40x128xf32>
    %44 = arith.maximumf %42, %43 : vector<40x128xf32>
    %c0_35 = arith.constant 0 : index
    %c0_36 = arith.constant 0 : index
    %45 = vector.load %arg5[%c0_35, %c0_36] : memref<40x128xf32, #tpu.memory_space<vmem>>, vector<40x128xf32>
    tpu.vector_store %arg5[%c0_35, %c0_36], %44 {strides = array<i32>} : memref<40x128xf32, #tpu.memory_space<vmem>>, vector<40x128xf32>,
    return
  }
  func.func @transform_0(%arg0: i32) -> (i32, i32) {
    %c0_i32 = arith.constant 0 : i32
    %c0_i32_0 = arith.constant 0 : i32
    return %arg0, %c0_i32 : i32, i32
  }
  func.func @transform_1(%arg0: i32) -> (i32, i32) {
    %c0_i32 = arith.constant 0 : i32
    %c0_i32_0 = arith.constant 0 : i32
    %c0_i32_1 = arith.constant 0 : i32
    return %c0_i32, %c0_i32_0 : i32, i32
  }
  func.func @transform_2(%arg0: i32) -> (i32, i32, i32) {
    %c0_i32 = arith.constant 0 : i32
    %c0_i32_0 = arith.constant 0 : i32
    %c0_i32_1 = arith.constant 0 : i32
    %c0_i32_2 = arith.constant 0 : i32
    return %c0_i32, %c0_i32_0, %c0_i32_1 : i32, i32, i32
  }
  func.func @transform_3(%arg0: i32) -> (i32, i32, i32) {
    %c0_i32 = arith.constant 0 : i32
    %c0_i32_0 = arith.constant 0 : i32
    %c0_i32_1 = arith.constant 0 : i32
    %c0_i32_2 = arith.constant 0 : i32
    return %c0_i32, %c0_i32_0, %c0_i32_1 : i32, i32, i32
  }
  func.func @transform_4(%arg0: i32) -> (i32, i32) {
    %c0_i32 = arith.constant 0 : i32
    %c0_i32_0 = arith.constant 0 : i32
    return %arg0, %c0_i32 : i32, i32
  }
}

</mosaic_0001>

<bundles_post_ra>
// kernel: tpu_custom_call.1
= control target key start
LH: loop header
LB: loop body
LE: loop exit
PB: predicated region body
PF: predicated region fallthrough
CT: control target
= control target key end

     0   :  { %9 = vsyncpa [#allocation3], 0  ;;  %s1225_s0 = inlined_call_operand.vmem [shape: f32[40,12], index: 0, kind: input, shape index: {}]   ;;  %s1226_s1 = inlined_call_operand.vmem [shape: f32[12,128], index: 1, kind: input, shape index: {}]   ;;  %s1227_s2 = inlined_call_operand.hbm [shape: f32[4,128,128], index: 2, kind: input, shape index: {}]   ;;  %s1228_s3 = inlined_call_operand.vmem [shape: f32[5,1,128], index: 3, kind: input, shape index: {}]   ;;  %s1229_s4 = inlined_call_operand.hbm [shape: f32[40,128], index: 4, kind: output, shape index: {}]  }
   0x1   :  { %10 = vsyncpa [#allocation4], 0  ;;  %s1025_s15 = smov [#allocation2]  }
   0x2   :  { %s20_s16 = sshll.u32 %s1025_s15, 4  ;;  %s21_s16 = int_to_ptr.vmem [resolvable:$true] %s20_s16 }
   0x3   :  { %s989_s17 = scalar_lea.vmem %s21_s16, 8192  ;;  %p994_p1 = scmp.lt.s32.totalorder %s21_s16, %s21_s16 }
   0x4   :  { %p990_p0 = scmp.ne.s32.totalorder %s21_s16, %s989_s17  ;;  %p995_p2 = scmp.lt.s32.totalorder %s989_s17, %s989_s17 }
   0x6   :  { %p996_p3 = por %p995_p2, %p994_p1 }
   0x8   :  { %p997_p4 = pnand %p996_p3, %p990_p0 }
   0xa   :  { %1000 = shalt.err (!%p997_p4)
}
   0xb   :  { %s1026_s18 = smov 128   ;;  %s1027_s19 = smov 8  }
   0xc   :  { %26 = dma.hbm_to_vmem [thread:$0]  %s1227_s2, 8192, %s21_s16, [#allocation3], %s1026_s18, %s1026_s18, %s1027_s19  }
   0xd   :  { %1021 = dma.done.wait [#allocation3], 8192  }
   0xe   :  { %1022 = vsyncadd [#allocation3], 4294959104  ;;  %v1028_v0 = vmov 0.0   ;;  %vm1029_vm0 = vmmov 0   ;;  %vm62_vm1 = vcmask 1043456   ;;  %v37_v2 = vld [vmem:[%s1226_s1] sm:$0xff] }
   0xf   :  { %768 = vmatprep.subr.mxu0 %v1028_v0  ;;  %772 = vmatprep.mubr.msk.f32.mxu0 %vm1029_vm0, %v1028_v0  ;;  %v38_v1 = vld [vmem:[%s1226_s1 + $0x8] sm:$0xf]  ;;  %v32_v3 = vld [vmem:[%s1225_s0] sm:$0xff]  ;;  %vm46_vm2 = vcmask 97280   ;;  %v176_v4 = vld [vmem:[#allocation2 + $0x78] sm:$0xff] }
  0x10   :  { %787 = vmatprep.subr.mxu1 %v1028_v0  ;;  %819 = vmatprep.mubr.msk.f32.mxu1 %vm1029_vm0, %v1028_v0  ;;  %v175_v5 = vld [vmem:[#allocation2 + $0x70] sm:$0xff]  ;;  %v174_v6 = vld [vmem:[#allocation2 + $0x68] sm:$0xff]  ;;  %v173_v8 = vld [vmem:[#allocation2 + $0x60] sm:$0xff] }
  0x11   :  { %769 = vmatpush3.msk.msra.mxu0 %vm62_vm1, %v38_v1  ;;  %788 = vmatpush3.msra.mxu1 %v176_v4  ;;  %v33_v7 = vld [vmem:[%s1225_s0 + $0x8] sm:$0xff]  ;;  %v172_v9 = vld [vmem:[#allocation2 + $0x58] sm:$0xff]  ;;  %v34_v10 = vld [vmem:[%s1225_s0 + $0x10] sm:$0xff] }
  0x12   :  { %770 = vmatprep.subr.mxu0 %v1028_v0  ;;  %789 = vmatprep.subr.mxu1 %v1028_v0  ;;  %v171_v11 = vld [vmem:[#allocation2 + $0x50] sm:$0xff]  ;;  %v170_v12 = vld [vmem:[#allocation2 + $0x48] sm:$0xff]  ;;  %v35_v13 = vld [vmem:[%s1225_s0 + $0x18] sm:$0xff] }
  0x13   :  { %771 = vmatpush3.msra.mxu0 %v37_v2  ;;  %790 = vmatpush3.msra.mxu1 %v175_v5  ;;  %v169_v14 = vld [vmem:[#allocation2 + $0x40] sm:$0xff]  ;;  %v168_v15 = vld [vmem:[#allocation2 + $0x38] sm:$0xff]  ;;  %v167_v17 = vld [vmem:[#allocation2 + $0x30] sm:$0xff] }
  0x14   :  { %773 = vmatmul.mubr.msk.f32.vlgmr.msra.gmra.mxu0 %vm46_vm2, %v32_v3  ;;  %791 = vmatprep.subr.mxu1 %v1028_v0  ;;  %v36_v16 = vld [vmem:[%s1225_s0 + $0x20] sm:$0xff]  ;;  %v166_v18 = vld [vmem:[#allocation2 + $0x28] sm:$0xff]  ;;  %v164_v20 = vld [vmem:[#allocation2 + $0x18] sm:$0xff] }
  0x15   :  { %775 = vmatprep.mubr.msk.f32.mxu0 %vm1029_vm0, %v1028_v0  ;;  %834 = vmatprep.subr.mxu0 %v1028_v0  ;;  %v165_v19 = vld [vmem:[#allocation2 + $0x20] sm:$0xff]  ;;  %v163_v21 = vld [vmem:[#allocation2 + $0x10] sm:$0xff]  ;;  %v162_v22 = vld [vmem:[#allocation2 + $0x8] sm:$0xff] }
  0x16   :  { %792 = vmatpush3.msra.mxu1 %v174_v6  ;;  %v161_v23 = vld [vmem:[#allocation2] sm:$0xff]  ;;  %v296_v24 = vld [vmem:[#allocation2 + $0xf8] sm:$0xff]  ;;  %v295_v25 = vld [vmem:[#allocation2 + $0xf0] sm:$0xff] }
  0x17   :  { %793 = vmatprep.subr.mxu1 %v1028_v0  ;;  %835 = vmatpush3.msra.mxu0 %v296_v24  ;;  %v294_v26 = vld [vmem:[#allocation2 + $0xe8] sm:$0xff]  ;;  %v293_v27 = vld [vmem:[#allocation2 + $0xe0] sm:$0xff]  ;;  %v292_v28 = vld [vmem:[#allocation2 + $0xd8] sm:$0xff] }
  0x18   :  { %776 = vmatmul.mubr.msk.f32.gmra.mxu0 %vm46_vm2, %v33_v7  ;;  %794 = vmatpush3.msra.mxu1 %v173_v8  ;;  %v291_v29 = vld [vmem:[#allocation2 + $0xd0] sm:$0xff]  ;;  %v290_v30 = vld [vmem:[#allocation2 + $0xc8] sm:$0xff]  ;;  %v289_v31 = vld [vmem:[#allocation2 + $0xc0] sm:$0xff] }
  0x19   :  { %778 = vmatprep.mubr.msk.f32.mxu0 %vm1029_vm0, %v1028_v0  ;;  %795 = vmatprep.subr.mxu1 %v1028_v0  ;;  %v288_v32 = vld [vmem:[#allocation2 + $0xb8] sm:$0xff]  ;;  %v287_v33 = vld [vmem:[#allocation2 + $0xb0] sm:$0xff]  ;;  %v286_v34 = vld [vmem:[#allocation2 + $0xa8] sm:$0xff] }
  0x1a   :  { %796 = vmatpush3.msra.mxu1 %v172_v9  ;;  %836 = vmatprep.subr.mxu0 %v1028_v0  ;;  %v285_v35 = vld [vmem:[#allocation2 + $0xa0] sm:$0xff]  ;;  %v284_v36 = vld [vmem:[#allocation2 + $0x98] sm:$0xff]  ;;  %v283_v58 = vld [vmem:[#allocation2 + $0x90] sm:$0xff] }
  0x1b   :  { %797 = vmatprep.subr.mxu1 %v1028_v0  ;;  %837 = vmatpush3.msra.mxu0 %v295_v25  ;;  %v662_v37 = vld [vmem:[%s1228_s3] ss:$0 sm:$0xff]  ;;  %v282_v59 = vld [vmem:[#allocation2 + $0x88] sm:$0xff]  ;;  %v416_v61 = vld [vmem:[#allocation2 + $0x178] sm:$0xff] }
  0x1c   :  { %779 = vmatmul.mubr.msk.f32.gmra.mxu0 %vm46_vm2, %v34_v10  ;;  %798 = vmatpush3.msra.mxu1 %v171_v11  ;;  %v281_v60 = vld [vmem:[#allocation2 + $0x80] sm:$0xff]  ;;  %v415_v62 = vld [vmem:[#allocation2 + $0x170] sm:$0xff]  ;;  %v414_v63 = vld [vmem:[#allocation2 + $0x168] sm:$0xff] }
  0x1d   :  { %781 = vmatprep.mubr.msk.f32.mxu0 %vm1029_vm0, %v1028_v0  ;;  %799 = vmatprep.subr.mxu1 %v1028_v0  ;;  %v413_v1 = vld [vmem:[#allocation2 + $0x160] sm:$0xff]  ;;  %v412_v2 = vld [vmem:[#allocation2 + $0x158] sm:$0xff]  ;;  %v411_v3 = vld [vmem:[#allocation2 + $0x150] sm:$0xff] }
  0x1e   :  { %800 = vmatpush3.msra.mxu1 %v170_v12  ;;  %838 = vmatprep.subr.mxu0 %v1028_v0  ;;  %v410_v4 = vld [vmem:[#allocation2 + $0x148] sm:$0xff]  ;;  %v409_v5 = vld [vmem:[#allocation2 + $0x140] sm:$0xff]  ;;  %v408_v6 = vld [vmem:[#allocation2 + $0x138] sm:$0xff] }
  0x1f   :  { %801 = vmatprep.subr.mxu1 %v1028_v0  ;;  %839 = vmatpush3.msra.mxu0 %v294_v26  ;;  %v407_v7 = vld [vmem:[#allocation2 + $0x130] sm:$0xff]  ;;  %v406_v8 = vld [vmem:[#allocation2 + $0x128] sm:$0xff]  ;;  %v405_v9 = vld [vmem:[#allocation2 + $0x120] sm:$0xff] }
  0x20   :  { %782 = vmatmul.mubr.msk.f32.gmra.mxu0 %vm46_vm2, %v35_v13  ;;  %802 = vmatpush3.msra.mxu1 %v169_v14  ;;  %v404_v10 = vld [vmem:[#allocation2 + $0x118] sm:$0xff]  ;;  %v670_v11 = vld [vmem:[%s1228_s3 + $0x1] ss:$0 sm:$0xff] }
  0x21   :  { %784 = vmatprep.mubr.msk.f32.mxu0 %vm1029_vm0, %v1028_v0  ;;  %803 = vmatprep.subr.mxu1 %v1028_v0 }
  0x22   :  { %804 = vmatpush3.msra.mxu1 %v168_v15  ;;  %840 = vmatprep.subr.mxu0 %v1028_v0 }
  0x23   :  { %805 = vmatprep.subr.mxu1 %v1028_v0  ;;  %841 = vmatpush3.msra.mxu0 %v293_v27 }
  0x24   :  { %785 = vmatmul.mubr.msk.f32.gmra.mxu0 %vm46_vm2, %v36_v16  ;;  %806 = vmatpush3.msra.mxu1 %v167_v17 }
  0x25   :  { %866 = vmatprep.mubr.msk.f32.mxu0 %vm1029_vm0, %v1028_v0  ;;  %807 = vmatprep.subr.mxu1 %v1028_v0 }
  0x26   :  { %808 = vmatpush3.msra.mxu1 %v166_v18  ;;  %842 = vmatprep.subr.mxu0 %v1028_v0 }
  0x27   :  { %809 = vmatprep.subr.mxu1 %v1028_v0  ;;  %843 = vmatpush3.msra.mxu0 %v292_v28 }
  0x28   :  { %810 = vmatpush3.msra.mxu1 %v165_v19  ;;  %844 = vmatprep.subr.mxu0 %v1028_v0 }
  0x29   :  { %811 = vmatprep.subr.mxu1 %v1028_v0  ;;  %845 = vmatpush3.msra.mxu0 %v291_v29 }
  0x2a   :  { %812 = vmatpush3.msra.mxu1 %v164_v20  ;;  %846 = vmatprep.subr.mxu0 %v1028_v0 }
  0x2b   :  { %813 = vmatprep.subr.mxu1 %v1028_v0  ;;  %847 = vmatpush3.msra.mxu0 %v290_v30 }
  0x2c   :  { %814 = vmatpush3.msra.mxu1 %v163_v21  ;;  %848 = vmatprep.subr.mxu0 %v1028_v0 }
  0x2d   :  { %815 = vmatprep.subr.mxu1 %v1028_v0  ;;  %849 = vmatpush3.msra.mxu0 %v289_v31 }
  0x2e   :  { %816 = vmatpush3.msra.mxu1 %v162_v22  ;;  %850 = vmatprep.subr.mxu0 %v1028_v0 }
  0x2f   :  { %817 = vmatprep.subr.mxu1 %v1028_v0  ;;  %851 = vmatpush3.msra.mxu0 %v288_v32  ;;  %v403_v32 = vld [vmem:[#allocation2 + $0x110] sm:$0xff] }
  0x30   :  { %818 = vmatpush3.msra.mxu1 %v161_v23  ;;  %852 = vmatprep.subr.mxu0 %v1028_v0 }
  0x31   :  { %881 = vmatprep.subr.mxu1 %v1028_v0  ;;  %853 = vmatpush3.msra.mxu0 %v287_v33  ;;  %v402_v33 = vld [vmem:[#allocation2 + $0x108] sm:$0xff] }
  0x32   :  { %854 = vmatprep.subr.mxu0 %v1028_v0 }
  0x33   :  { %855 = vmatpush3.msra.mxu0 %v286_v34  ;;  %v401_v34 = vld [vmem:[#allocation2 + $0x100] sm:$0xff] }
  0x34   :  { %856 = vmatprep.subr.mxu0 %v1028_v0 }
  0x35   :  { %857 = vmatpush3.msra.mxu0 %v285_v35  ;;  %v536_v35 = vld [vmem:[#allocation2 + $0x1f8] sm:$0xff] }
  0x36   :  { %858 = vmatprep.subr.mxu0 %v1028_v0 }
  0x37   :  { %859 = vmatpush3.msra.mxu0 %v284_v36  ;;  %v535_v36 = vld [vmem:[#allocation2 + $0x1f0] sm:$0xff] }
  0x38   :  { %860 = vmatprep.subr.mxu0 %v1028_v0 }
  0x39   :  { %861 = vmatpush3.msra.mxu0 %v283_v58 }
  0x3a   :  { %862 = vmatprep.subr.mxu0 %v1028_v0 }
  0x3b   :  { %863 = vmatpush3.msra.mxu0 %v282_v59 }
  0x3c   :  { %864 = vmatprep.subr.mxu0 %v1028_v0 }
  0x3d   :  { %865 = vmatpush3.msra.mxu0 %v281_v60 }
  0x3e   :  { %928 = vmatprep.subr.mxu0 %v1028_v0 }
  0xd4   :  { %v132_v38 = vpop.f32.mrf.mxu0 }
  0xd5   :  { %v133_v39 = vadd.f32 %v662_v37, %v132_v38  ;;  %v533_v38 = vld [vmem:[#allocation2 + $0x1e0] sm:$0xff] }
  0xd6   :  { %v774_v40 = vpop.f32.mrf.mxu0 }
  0xd7   :  { %v156_v41 = vmax.f32 %v133_v39, 0.0  ;;  %v532_v39 = vld [vmem:[#allocation2 + $0x1d8] sm:$0xff]  ;;  %v531_v40 = vld [vmem:[#allocation2 + $0x1d0] sm:$0xff] }
  0xd8   :  { %v137_v42 = vpop.f32.mrf.mxu0 }
  0xd9   :  { %v138_v43 = vadd.f32 %v662_v37, %v137_v42  ;;  %820 = vmatmul.mubr.f32.vlgmr.msra.gmra.mxu1 %v156_v41  ;;  %v530_v41 = vld [vmem:[#allocation2 + $0x1c8] sm:$0xff]  ;;  %v529_v42 = vld [vmem:[#allocation2 + $0x1c0] sm:$0xff] }
  0xda   :  { %v777_v44 = vpop.f32.mrf.mxu0  ;;  %822 = vmatprep.mubr.msk.f32.mxu1 %vm1029_vm0, %v1028_v0  ;;  %882 = vmatpush3.msra.mxu1 %v416_v61 }
  0xdb   :  { %v157_v45 = vmax.f32 %v138_v43, 0.0  ;;  %883 = vmatprep.subr.mxu1 %v1028_v0  ;;  %v528_v43 = vld [vmem:[#allocation2 + $0x1b8] sm:$0xff]  ;;  %v527_v44 = vld [vmem:[#allocation2 + $0x1b0] sm:$0xff] }
  0xdc   :  { %v142_v46 = vpop.f32.mrf.mxu0  ;;  %884 = vmatpush3.msra.mxu1 %v415_v62 }
  0xdd   :  { %v143_v47 = vadd.f32 %v662_v37, %v142_v46  ;;  %823 = vmatmul.mubr.f32.gmra.mxu1 %v157_v45  ;;  %885 = vmatprep.subr.mxu1 %v1028_v0  ;;  %v526_v45 = vld [vmem:[#allocation2 + $0x1a8] sm:$0xff]  ;;  %v525_v46 = vld [vmem:[#allocation2 + $0x1a0] sm:$0xff] }
  0xde   :  { %v780_v48 = vpop.f32.mrf.mxu0  ;;  %825 = vmatprep.mubr.msk.f32.mxu1 %vm1029_vm0, %v1028_v0  ;;  %886 = vmatpush3.msra.mxu1 %v414_v63 }
  0xdf   :  { %v158_v49 = vmax.f32 %v143_v47, 0.0  ;;  %887 = vmatprep.subr.mxu1 %v1028_v0  ;;  %v524_v47 = vld [vmem:[#allocation2 + $0x198] sm:$0xff]  ;;  %v672_v48 = vld [vmem:[%s1228_s3 + $0x2] ss:$0 sm:$0xff] }
  0xe0   :  { %v147_v50 = vpop.f32.mrf.mxu0  ;;  %888 = vmatpush3.msra.mxu1 %v413_v1 }
  0xe1   :  { %v148_v51 = vadd.f32 %v662_v37, %v147_v50  ;;  %826 = vmatmul.mubr.f32.gmra.mxu1 %v158_v49  ;;  %889 = vmatprep.subr.mxu1 %v1028_v0 }
  0xe2   :  { %v783_v52 = vpop.f32.mrf.mxu0  ;;  %828 = vmatprep.mubr.msk.f32.mxu1 %vm1029_vm0, %v1028_v0  ;;  %890 = vmatpush3.msra.mxu1 %v412_v2 }
  0xe3   :  { %v159_v53 = vmax.f32 %v148_v51, 0.0  ;;  %891 = vmatprep.subr.mxu1 %v1028_v0 }
  0xe4   :  { %v152_v54 = vpop.f32.mrf.mxu0  ;;  %892 = vmatpush3.msra.mxu1 %v411_v3 }
  0xe5   :  { %v153_v55 = vadd.f32 %v662_v37, %v152_v54  ;;  %829 = vmatmul.mubr.f32.gmra.mxu1 %v159_v53  ;;  %893 = vmatprep.subr.mxu1 %v1028_v0  ;;  %v534_v37 = vld [vmem:[#allocation2 + $0x1e8] sm:$0xff] }
  0xe6   :  { %v786_v56 = vpop.f32.mrf.mxu0  ;;  %831 = vmatprep.mubr.msk.f32.mxu1 %vm1029_vm0, %v1028_v0  ;;  %894 = vmatpush3.msra.mxu1 %v410_v4 }
  0xe7   :  { %v160_v57 = vmax.f32 %v153_v55, 0.0  ;;  %895 = vmatprep.subr.mxu1 %v1028_v0 }
  0xe8   :  { %896 = vmatpush3.msra.mxu1 %v409_v5 }
  0xe9   :  { %832 = vmatmul.mubr.f32.gmra.mxu1 %v160_v57  ;;  %897 = vmatprep.subr.mxu1 %v1028_v0 }
  0xea   :  { %913 = vmatprep.mubr.msk.f32.mxu1 %vm1029_vm0, %v1028_v0  ;;  %898 = vmatpush3.msra.mxu1 %v408_v6  ;;  %v523_v6 = vld [vmem:[#allocation2 + $0x190] sm:$0xff] }
  0xeb   :  { %899 = vmatprep.subr.mxu1 %v1028_v0 }
  0xec   :  { %900 = vmatpush3.msra.mxu1 %v407_v7  ;;  %v522_v7 = vld [vmem:[#allocation2 + $0x188] sm:$0xff] }
  0xed   :  { %901 = vmatprep.subr.mxu1 %v1028_v0 }
  0xee   :  { %902 = vmatpush3.msra.mxu1 %v406_v8  ;;  %v521_v8 = vld [vmem:[#allocation2 + $0x180] sm:$0xff] }
  0xef   :  { %903 = vmatprep.subr.mxu1 %v1028_v0 }
  0xf0   :  { %904 = vmatpush3.msra.mxu1 %v405_v9  ;;  %v674_v9 = vld [vmem:[%s1228_s3 + $0x3] ss:$0 sm:$0xff] }
  0xf1   :  { %905 = vmatprep.subr.mxu1 %v1028_v0 }
  0xf2   :  { %906 = vmatpush3.msra.mxu1 %v404_v10 }
  0xf3   :  { %907 = vmatprep.subr.mxu1 %v1028_v0 }
  0xf4   :  { %908 = vmatpush3.msra.mxu1 %v403_v32 }
  0xf5   :  { %909 = vmatprep.subr.mxu1 %v1028_v0 }
  0xf6   :  { %910 = vmatpush3.msra.mxu1 %v402_v33 }
  0xf7   :  { %911 = vmatprep.subr.mxu1 %v1028_v0 }
  0xf8   :  { %912 = vmatpush3.msra.mxu1 %v401_v34 }
 0x199   :  { %v251_v12 = vpop.f32.mrf.mxu1 }
 0x19a   :  { %v252_v13 = vadd.f32 %v670_v11, %v251_v12 }
 0x19b   :  { %v821_v14 = vpop.f32.mrf.mxu1 }
 0x19c   :  { %v275_v15 = vmax.f32 %v252_v13, 0.0 }
 0x19d   :  { %v256_v16 = vpop.f32.mrf.mxu1 }
 0x19e   :  { %v257_v17 = vadd.f32 %v670_v11, %v256_v16  ;;  %867 = vmatmul.mubr.f32.vlgmr.msra.gmra.mxu0 %v275_v15 }
 0x19f   :  { %v824_v18 = vpop.f32.mrf.mxu1  ;;  %869 = vmatprep.mubr.msk.f32.mxu0 %vm1029_vm0, %v1028_v0  ;;  %929 = vmatpush3.msra.mxu0 %v536_v35 }
 0x1a0   :  { %v276_v19 = vmax.f32 %v257_v17, 0.0  ;;  %930 = vmatprep.subr.mxu0 %v1028_v0 }
 0x1a1   :  { %v261_v20 = vpop.f32.mrf.mxu1  ;;  %931 = vmatpush3.msra.mxu0 %v535_v36 }
 0x1a2   :  { %v262_v21 = vadd.f32 %v670_v11, %v261_v20  ;;  %870 = vmatmul.mubr.f32.gmra.mxu0 %v276_v19  ;;  %932 = vmatprep.subr.mxu0 %v1028_v0 }
 0x1a3   :  { %v827_v22 = vpop.f32.mrf.mxu1  ;;  %872 = vmatprep.mubr.msk.f32.mxu0 %vm1029_vm0, %v1028_v0  ;;  %933 = vmatpush3.msra.mxu0 %v534_v37 }
 0x1a4   :  { %v277_v23 = vmax.f32 %v262_v21, 0.0  ;;  %934 = vmatprep.subr.mxu0 %v1028_v0 }
 0x1a5   :  { %v266_v24 = vpop.f32.mrf.mxu1  ;;  %935 = vmatpush3.msra.mxu0 %v533_v38 }
 0x1a6   :  { %v267_v25 = vadd.f32 %v670_v11, %v266_v24  ;;  %873 = vmatmul.mubr.f32.gmra.mxu0 %v277_v23  ;;  %936 = vmatprep.subr.mxu0 %v1028_v0 }
 0x1a7   :  { %v830_v26 = vpop.f32.mrf.mxu1  ;;  %875 = vmatprep.mubr.msk.f32.mxu0 %vm1029_vm0, %v1028_v0  ;;  %937 = vmatpush3.msra.mxu0 %v532_v39 }
 0x1a8   :  { %v278_v27 = vmax.f32 %v267_v25, 0.0  ;;  %938 = vmatprep.subr.mxu0 %v1028_v0 }
 0x1a9   :  { %v271_v28 = vpop.f32.mrf.mxu1  ;;  %939 = vmatpush3.msra.mxu0 %v531_v40 }
 0x1aa   :  { %v272_v29 = vadd.f32 %v670_v11, %v271_v28  ;;  %876 = vmatmul.mubr.f32.gmra.mxu0 %v278_v27  ;;  %940 = vmatprep.subr.mxu0 %v1028_v0 }
 0x1ab   :  { %v833_v30 = vpop.f32.mrf.mxu1  ;;  %878 = vmatprep.mubr.msk.f32.mxu0 %vm1029_vm0, %v1028_v0  ;;  %941 = vmatpush3.msra.mxu0 %v530_v41 }
 0x1ac   :  { %v279_v31 = vmax.f32 %v272_v29, 0.0  ;;  %942 = vmatprep.subr.mxu0 %v1028_v0  ;;  %v676_v30 = vld [vmem:[%s1228_s3 + $0x4] ss:$0 sm:$0xff]  ;;  %s1030_s3 = smov [#allocation5]  }
 0x1ad   :  { %943 = vmatpush3.msra.mxu0 %v529_v42  ;;  %s650_s17 = sshll.u32 %s1030_s3, 4  ;;  %s651_s17 = int_to_ptr.vmem [resolvable:$true] %s650_s17 }
 0x1ae   :  { %879 = vmatmul.mubr.f32.gmra.mxu0 %v279_v31  ;;  %944 = vmatprep.subr.mxu0 %v1028_v0  ;;  %s1001_s20 = scalar_lea.vmem %s651_s17, 640  ;;  %p1006_p6 = scmp.lt.s32.totalorder %s651_s17, %s651_s17 }
 0x1af   :  { %960 = vmatprep.mubr.msk.f32.mxu0 %vm1029_vm0, %v1028_v0  ;;  %945 = vmatpush3.msra.mxu0 %v528_v43  ;;  %p1002_p5 = scmp.ne.s32.totalorder %s651_s17, %s1001_s20  ;;  %p1007_p7 = scmp.lt.s32.totalorder %s1001_s20, %s1001_s20 }
 0x1b0   :  { %946 = vmatprep.subr.mxu0 %v1028_v0 }
 0x1b1   :  { %947 = vmatpush3.msra.mxu0 %v527_v44  ;;  %p1008_p8 = por %p1007_p7, %p1006_p6 }
 0x1b2   :  { %948 = vmatprep.subr.mxu0 %v1028_v0 }
 0x1b3   :  { %949 = vmatpush3.msra.mxu0 %v526_v45  ;;  %p1009_p9 = pnand %p1008_p8, %p1002_p5 }
 0x1b4   :  { %950 = vmatprep.subr.mxu0 %v1028_v0 }
 0x1b5   :  { %951 = vmatpush3.msra.mxu0 %v525_v46 }
 0x1b6   :  { %952 = vmatprep.subr.mxu0 %v1028_v0 }
 0x1b7   :  { %953 = vmatpush3.msra.mxu0 %v524_v47 }
 0x1b8   :  { %954 = vmatprep.subr.mxu0 %v1028_v0 }
 0x1b9   :  { %955 = vmatpush3.msra.mxu0 %v523_v6 }
 0x1ba   :  { %956 = vmatprep.subr.mxu0 %v1028_v0 }
 0x1bb   :  { %957 = vmatpush3.msra.mxu0 %v522_v7 }
 0x1bc   :  { %958 = vmatprep.subr.mxu0 %v1028_v0 }
 0x1bd   :  { %959 = vmatpush3.msra.mxu0 %v521_v8 }
 0x25e   :  { %v371_v49 = vpop.f32.mrf.mxu0 }
 0x25f   :  { %v372_v50 = vadd.f32 %v672_v48, %v371_v49 }
 0x260   :  { %v868_v51 = vpop.f32.mrf.mxu0 }
 0x261   :  { %v395_v52 = vmax.f32 %v372_v50, 0.0 }
 0x262   :  { %v376_v53 = vpop.f32.mrf.mxu0 }
 0x263   :  { %v377_v54 = vadd.f32 %v672_v48, %v376_v53  ;;  %914 = vmatmul.mubr.f32.vlgmr.msra.gmra.mxu1 %v395_v52 }
 0x264   :  { %v871_v55 = vpop.f32.mrf.mxu0  ;;  %916 = vmatprep.mubr.msk.f32.mxu1 %vm1029_vm0, %v1028_v0 }
 0x265   :  { %v396_v56 = vmax.f32 %v377_v54, 0.0 }
 0x266   :  { %v381_v57 = vpop.f32.mrf.mxu0 }
 0x267   :  { %v382_v58 = vadd.f32 %v672_v48, %v381_v57  ;;  %917 = vmatmul.mubr.f32.gmra.mxu1 %v396_v56 }
 0x268   :  { %v874_v59 = vpop.f32.mrf.mxu0  ;;  %919 = vmatprep.mubr.msk.f32.mxu1 %vm1029_vm0, %v1028_v0 }
 0x269   :  { %v397_v60 = vmax.f32 %v382_v58, 0.0 }
 0x26a   :  { %v386_v61 = vpop.f32.mrf.mxu0 }
 0x26b   :  { %v387_v62 = vadd.f32 %v672_v48, %v386_v61  ;;  %920 = vmatmul.mubr.f32.gmra.mxu1 %v397_v60 }
 0x26c   :  { %v877_v63 = vpop.f32.mrf.mxu0  ;;  %922 = vmatprep.mubr.msk.f32.mxu1 %vm1029_vm0, %v1028_v0 }
 0x26d   :  { %v398_v1 = vmax.f32 %v387_v62, 0.0 }
 0x26e   :  { %v391_v2 = vpop.f32.mrf.mxu0 }
 0x26f   :  { %v392_v3 = vadd.f32 %v672_v48, %v391_v2  ;;  %923 = vmatmul.mubr.f32.gmra.mxu1 %v398_v1 }
 0x270   :  { %v880_v4 = vpop.f32.mrf.mxu0  ;;  %925 = vmatprep.mubr.msk.f32.mxu1 %vm1029_vm0, %v1028_v0 }
 0x271   :  { %v399_v5 = vmax.f32 %v392_v3, 0.0 }
 0x273   :  { %926 = vmatmul.mubr.f32.gmra.mxu1 %v399_v5 }
 0x323   :  { %v491_v10 = vpop.f32.mrf.mxu1 }
 0x324   :  { %v492_v11 = vadd.f32 %v674_v9, %v491_v10 }
 0x325   :  { %v915_v12 = vpop.f32.mrf.mxu1 }
 0x326   :  { %v515_v13 = vmax.f32 %v492_v11, 0.0 }
 0x327   :  { %v496_v14 = vpop.f32.mrf.mxu1 }
 0x328   :  { %v497_v15 = vadd.f32 %v674_v9, %v496_v14  ;;  %961 = vmatmul.mubr.f32.vlgmr.msra.gmra.mxu0 %v515_v13 }
 0x329   :  { %v918_v16 = vpop.f32.mrf.mxu1  ;;  %963 = vmatprep.mubr.msk.f32.mxu0 %vm1029_vm0, %v1028_v0 }
 0x32a   :  { %v516_v17 = vmax.f32 %v497_v15, 0.0 }
 0x32b   :  { %v501_v18 = vpop.f32.mrf.mxu1 }
 0x32c   :  { %v502_v19 = vadd.f32 %v674_v9, %v501_v18  ;;  %964 = vmatmul.mubr.f32.gmra.mxu0 %v516_v17 }
 0x32d   :  { %v921_v20 = vpop.f32.mrf.mxu1  ;;  %966 = vmatprep.mubr.msk.f32.mxu0 %vm1029_vm0, %v1028_v0 }
 0x32e   :  { %v517_v21 = vmax.f32 %v502_v19, 0.0 }
 0x32f   :  { %v506_v22 = vpop.f32.mrf.mxu1 }
 0x330   :  { %v507_v23 = vadd.f32 %v674_v9, %v506_v22  ;;  %967 = vmatmul.mubr.f32.gmra.mxu0 %v517_v21 }
 0x331   :  { %v924_v24 = vpop.f32.mrf.mxu1  ;;  %969 = vmatprep.mubr.msk.f32.mxu0 %vm1029_vm0, %v1028_v0 }
 0x332   :  { %v518_v25 = vmax.f32 %v507_v23, 0.0 }
 0x333   :  { %v511_v26 = vpop.f32.mrf.mxu1 }
 0x334   :  { %v512_v27 = vadd.f32 %v674_v9, %v511_v26  ;;  %970 = vmatmul.mubr.f32.gmra.mxu0 %v518_v25 }
 0x335   :  { %v927_v28 = vpop.f32.mrf.mxu1  ;;  %972 = vmatprep.mubr.msk.f32.mxu0 %vm1029_vm0, %v1028_v0 }
 0x336   :  { %v519_v29 = vmax.f32 %v512_v27, 0.0 }
 0x338   :  { %973 = vmatmul.mubr.f32.gmra.mxu0 %v519_v29 }
 0x3e8   :  { %v611_v31 = vpop.f32.mrf.mxu0 }
 0x3e9   :  { %v612_v32 = vadd.f32 %v676_v30, %v611_v31 }
 0x3ea   :  { %v962_v33 = vpop.f32.mrf.mxu0 }
 0x3eb   :  { %v635_v34 = vmax.f32 %v612_v32, 0.0 }
 0x3ec   :  { %v616_v35 = vpop.f32.mrf.mxu0 }
 0x3ed   :  { %640 = vst [vmem:[#allocation5] sm:$0xff] %v635_v34  ;;  %v617_v36 = vadd.f32 %v676_v30, %v616_v35 }
 0x3ee   :  { %v965_v37 = vpop.f32.mrf.mxu0 }
 0x3ef   :  { %v636_v38 = vmax.f32 %v617_v36, 0.0 }
 0x3f0   :  { %v621_v39 = vpop.f32.mrf.mxu0 }
 0x3f1   :  { %641 = vst [vmem:[#allocation5 + $0x8] sm:$0xff] %v636_v38  ;;  %v622_v40 = vadd.f32 %v676_v30, %v621_v39 }
 0x3f2   :  { %v968_v41 = vpop.f32.mrf.mxu0 }
 0x3f3   :  { %v637_v0 = vmax.f32 %v622_v40, 0.0 }
 0x3f4   :  { %v626_v42 = vpop.f32.mrf.mxu0 }
 0x3f5   :  { %642 = vst [vmem:[#allocation5 + $0x10] sm:$0xff] %v637_v0  ;;  %v627_v43 = vadd.f32 %v676_v30, %v626_v42 }
 0x3f6   :  { %v971_v44 = vpop.f32.mrf.mxu0 }
 0x3f7   :  { %v638_v45 = vmax.f32 %v627_v43, 0.0 }
 0x3f8   :  { %v631_v46 = vpop.f32.mrf.mxu0 }
 0x3f9   :  { %643 = vst [vmem:[#allocation5 + $0x18] sm:$0xff] %v638_v45  ;;  %v632_v47 = vadd.f32 %v676_v30, %v631_v46 }
 0x3fa   :  { %v974_v48 = vpop.f32.mrf.mxu0 }
 0x3fb   :  { %v639_v49 = vmax.f32 %v632_v47, 0.0 }
 0x3fd   :  { %644 = vst [vmem:[#allocation5 + $0x20] sm:$0xff] %v639_v49 }
 0x3fe   :  { %1012 = shalt.err (!%p1009_p9)
}
 0x3ff   :  { %656 = dma.vmem_to_hbm [thread:$0]  %s651_s17, 640, %s1229_s4, [#allocation4], %s1026_s18, %s1026_s18, %s1027_s19  }
 0x400   :  { %1023 = dma.done.wait [#allocation4], 640  }
 0x401   :  { %1024 = vsyncadd [#allocation4], 4294966656 }
 0x402   :  { %660 = vsyncpa [#allocation3], 1 }
 0x403   :  { %661 = vsyncpa [#allocation4], 1 }

</bundles_post_ra>
